<compile_context>
chip_gen: v7x
topology: tpu7x:2x2x1
jax: 0.10.0
libtpu: 0.0.40
codegen_flags: <defaults>
</compile_context>

<pallas_src>
import jax
import jax.numpy as jnp
from jax.experimental import pallas as pl
from jax.experimental.pallas import tpu as pltpu


def _pos_enc_kernel(x_ref, p_ref, o_ref):
    # x_ref: (TB, TN) input tile, p_ref: (1, TN) positional-params tile,
    # o_ref: (TB, TN) output tile.  One broadcasted vadd per vreg; the add
    # happens in the promoted dtype, then casts to the output dtype.
    o_ref[...] = (x_ref[...] + p_ref[...]).astype(o_ref.dtype)


def _generation_config() -> tuple[int, int | None, bool]:
    """Returns (tile_budget_bytes, vmem_limit_bytes_or_None, is_two_core_chip)."""
    kind = ""
    try:
        kind = jax.devices()[0].device_kind.lower()
    except Exception:  # pragma: no cover - defensive; fall back to safe defaults
        pass
    if "v7" in kind:
        # 2 TCs/chip, 64 MiB physical VMEM per TC, 32 MiB default scoped.
        # 4x tile (double-buffered in+out) + param tile ~= 25-26 MiB.
        return 6 * 1024 * 1024, 30 * 1024 * 1024, True
    if "v6" in kind:
        # 32 MiB default scoped VMEM; 4x4 MiB = 16 MiB footprint, no flag needed.
        return 4 * 1024 * 1024, None, False
    # v5e and unknown generations: 16 MiB default scoped VMEM -> stay at 2 MiB.
    return 2 * 1024 * 1024, None, False


def positional_encoding(
    x: jax.Array,
    embedding_params: jax.Array,
    *,
    donate_x: bool = False,
) -> jax.Array:
    """x: (B, S, E), embedding_params: (S, E) -> (B, S, E)."""
    B, S, E = x.shape
    assert embedding_params.shape == (S, E)

    N = S * E
    out_dtype = jnp.result_type(x.dtype, embedding_params.dtype)
    x_isize = jnp.dtype(x.dtype).itemsize
    p_isize = jnp.dtype(embedding_params.dtype).itemsize
    o_isize = jnp.dtype(out_dtype).itemsize
    big_isize = max(x_isize, o_isize)

    tile_budget, vmem_limit, is_two_core = _generation_config()

    # Lane-dense flattened views (contiguous reshapes; free in XLA).
    x2 = x.reshape(B, N)
    p2 = embedding_params.reshape(1, N)

    # --- Column (lane) tiling -----------------------------------------------
    # Prefer the full flattened width (fully contiguous row-strip DMAs and a
    # single param fetch); only split columns if even an 8-row tile would
    # exceed the per-generation budget.
    if N <= 128 or 8 * N * big_isize <= tile_budget:
        TN = N
    else:
        TN = (tile_budget // (8 * big_isize)) // 128 * 128
        TN = int(max(128, min(TN, N)))

    # --- Row (sublane) tiling -------------------------------------------------
    rows_fit = max(1, tile_budget // (TN * big_isize))
    if B <= rows_fit:
        TB = B
    else:
        TB = int(max(8, (rows_fit // 8) * 8))
        TB = min(TB, B)

    num_col_blocks = pl.cdiv(N, TN)

    # Only force a row split on 2-TensorCore chips (v7x), and only when the
    # grid would otherwise be a single block; on single-TC parts it is a pure
    # extra serial grid step.
    if (
        is_two_core
        and TB == B
        and num_col_blocks == 1
        and B >= 16
        and B % 16 == 0
        and B * TN * big_isize > (1 << 20)
    ):
        TB = B // 2

    num_row_blocks = pl.cdiv(B, TB)

    # Row axis INNER so the params block index (0, j) is constant across
    # consecutive grid steps -> Pallas skips the redundant param re-DMA.
    grid = (num_col_blocks, num_row_blocks)

    cost = pl.CostEstimate(
        flops=B * N,
        transcendentals=0,
        bytes_accessed=B * N * x_isize + N * p_isize + B * N * o_isize,
    )

    compiler_params = pltpu.CompilerParams(
        dimension_semantics=("parallel", "parallel"),
        vmem_limit_bytes=vmem_limit,
    )

    out2 = pl.pallas_call(
        _pos_enc_kernel,
        out_shape=jax.ShapeDtypeStruct((B, N), out_dtype),
        grid_spec=pltpu.PrefetchScalarGridSpec(
            num_scalar_prefetch=0,
            grid=grid,
            in_specs=[
                pl.BlockSpec((TB, TN), lambda j, i: (i, j)),
                pl.BlockSpec((1, TN), lambda j, i: (0, j)),
            ],
            out_specs=pl.BlockSpec((TB, TN), lambda j, i: (i, j)),
        ),
        compiler_params=compiler_params,
        cost_estimate=cost,
        # Optional footprint win when the caller donates x (and dtypes match):
        input_output_aliases=(
            {0: 0} if (donate_x and x.dtype == out_dtype) else {}
        ),
    )(x2, p2)

    return out2.reshape(B, S, E)


if __name__ == "__main__":
    # Small shapes consistent with the module: batch=2, sequence=8, embedding=32
    B, S, E = 2, 8, 32

    key = jax.random.PRNGKey(0)
    k_x, k_p = jax.random.split(key)

    x = jax.random.normal(k_x, (B, S, E), dtype=jnp.float32)
    # Deterministic parameter init (mirrors torch.randn(sequence_size, embedding_size))
    embedding_params = jax.random.normal(k_p, (S, E), dtype=jnp.float32)

    out = positional_encoding(x, embedding_params)
    out = jax.block_until_ready(out)

    # Reference check in plain JAX
    ref = x + embedding_params[None, :, :]
    assert out.shape == (B, S, E)
    assert out.dtype == ref.dtype
    assert jnp.allclose(out, ref, atol=1e-6), "Mismatch vs reference"

    print("KERNEL_OK")
</pallas_src>

<mosaic_0001>
module attributes {stable_mosaic.version = 11 : i64} {
  func.func @_pos_enc_kernel(%arg0: i32, %arg1: i32, %arg2: memref<2x256xf32, #tpu.memory_space<vmem>>, %arg3: memref<1x256xf32, #tpu.memory_space<vmem>>, %arg4: memref<2x256xf32, #tpu.memory_space<vmem>>) attributes {dimension_semantics = [#tpu.dimension_semantics<parallel>, #tpu.dimension_semantics<parallel>], iteration_bounds = array<i64: 1, 1>, scalar_prefetch = 0 : i64, scratch_operands = 0 : i64, tpu.core_type = #tpu.core_type<tc>, window_params = [{transform_indices = @transform_0, window_bounds = array<i64: 2, 256>}, {transform_indices = @transform_1, window_bounds = array<i64: 1, 256>}, {transform_indices = @transform_2, window_bounds = array<i64: 2, 256>}]} {
    %c0 = arith.constant 0 : index
    %c0_0 = arith.constant 0 : index
    %0 = vector.load %arg2[%c0, %c0_0] : memref<2x256xf32, #tpu.memory_space<vmem>>, vector<2x256xf32>
    %c0_1 = arith.constant 0 : index
    %c0_2 = arith.constant 0 : index
    %1 = vector.load %arg3[%c0_1, %c0_2] : memref<1x256xf32, #tpu.memory_space<vmem>>, vector<1x256xf32>
    %2 = vector.broadcast %1 : vector<1x256xf32> to vector<2x256xf32>
    %3 = arith.addf %0, %2 : vector<2x256xf32>
    %c0_3 = arith.constant 0 : index
    %c0_4 = arith.constant 0 : index
    %4 = vector.load %arg4[%c0_3, %c0_4] : memref<2x256xf32, #tpu.memory_space<vmem>>, vector<2x256xf32>
    tpu.vector_store %arg4[%c0_3, %c0_4], %3 {strides = array<i32>} : memref<2x256xf32, #tpu.memory_space<vmem>>, vector<2x256xf32>,
    return
  }
  func.func @transform_0(%arg0: i32, %arg1: i32) -> (i32, i32) {
    %c0_i32 = arith.constant 0 : i32
    return %arg1, %arg0 : i32, i32
  }
  func.func @transform_1(%arg0: i32, %arg1: i32) -> (i32, i32) {
    %c0_i32 = arith.constant 0 : i32
    %c0_i32_0 = arith.constant 0 : i32
    return %c0_i32, %arg0 : i32, i32
  }
  func.func @transform_2(%arg0: i32, %arg1: i32) -> (i32, i32) {
    %c0_i32 = arith.constant 0 : i32
    return %arg1, %arg0 : i32, i32
  }
}

</mosaic_0001>

<bundles_post_ra>
// kernel: tpu_custom_call.1
= control target key start
LH: loop header
LB: loop body
LE: loop exit
PB: predicated region body
PF: predicated region fallthrough
CT: control target
= control target key end

     0   :  { %7 = vsyncpa [#allocation3], 0  ;;  %s157_s0 = inlined_call_operand.hbm [shape: f32[2,256], index: 0, kind: input, shape index: {}]   ;;  %s158_s1 = inlined_call_operand.vmem [shape: f32[1,256], index: 1, kind: input, shape index: {}]   ;;  %s159_s2 = inlined_call_operand.hbm [shape: f32[2,256], index: 2, kind: output, shape index: {}]  }
   0x1   :  { %8 = vsyncpa [#allocation4], 0  ;;  %s112_s9 = smov [#allocation2]   ;;  %s64_s13 = scalar_lea.hbm %s157_s0, 64 }
   0x2   :  { %s15_s10 = sshll.u32 %s112_s9, 4  ;;  %p65_p0 = scmp.ne.s32.totalorder %s157_s0, %s64_s13  ;;  %s16_s10 = int_to_ptr.vmem [resolvable:$true] %s15_s10 }
   0x3   :  { %p68_p1 = scmp.lt.u32.totalorder %s64_s13, %s157_s0 }
   0x5   :  { %p70_p2 = pnand %p68_p1, %p65_p0 }
   0x7   :  { %73 = shalt.err (!%p70_p2)
}
   0x8   :  { %s74_s18 = scalar_lea.vmem %s16_s10, 64  ;;  %p79_p4 = scmp.lt.s32.totalorder %s16_s10, %s16_s10 }
   0x9   :  { %p75_p3 = scmp.ne.s32.totalorder %s16_s10, %s74_s18  ;;  %p80_p5 = scmp.lt.s32.totalorder %s74_s18, %s74_s18 }
   0xb   :  { %p81_p6 = por %p80_p5, %p79_p4 }
   0xd   :  { %p82_p7 = pnand %p81_p6, %p75_p3 }
   0xf   :  { %85 = shalt.err (!%p82_p7)
}
  0x10   :  { %18 = dma.hbm_to_vmem [thread:$0]  %s157_s0, 64, %s16_s10, [#allocation3]  }
  0x11   :  { %108 = dma.done.wait [#allocation3], 64  }
  0x12   :  { %109 = vsyncadd [#allocation3], 4294967232  ;;  %v27_v0 = vlaneseq  ;;  %v113_v1 = vmov 1983009808   ;;  %v25_v7 = vld [vmem:[%s158_s1] sm:$0x3] }
  0x13   :  { %v37_v2 = vunpack.c.l.s4 %v113_v1  ;;  %v24_v12 = vld [vmem:[#allocation2] sm:$0xf]  ;;  %s114_s23 = smov [#allocation5]  }
  0x14   :  { %v28_v3 = vshrl.u32 %v27_v0, 7  ;;  %s52_s0 = sshll.u32 %s114_s23, 4  ;;  %s53_s0 = int_to_ptr.vmem [resolvable:$true] %s52_s0 }
  0x15   :  { %v38_v6 = vunpack.c.0.s8 %v37_v2  ;;  %s86_s24 = scalar_lea.vmem %s53_s0, 64  ;;  %p91_p9 = scmp.lt.s32.totalorder %s53_s0, %s53_s0 }
  0x16   :  { %v29_v4 = vsub.s32 0, %v28_v3  ;;  %v33_v5 = vsub.s32 1, %v28_v3  ;;  %p87_p8 = scmp.ne.s32.totalorder %s53_s0, %s86_s24  ;;  %p92_p10 = scmp.lt.s32.totalorder %s86_s24, %s86_s24 }
  0x17   :  { %v41_v10 = vsub.s32 %v38_v6, %v28_v3 }
  0x18   :  { %v30_v8 = vrot.slane %v25_v7, %v29_v4  ;;  %v34_v9 = vrot.slane %v25_v7, %v33_v5  ;;  %p93_p11 = por %p92_p10, %p91_p9 }
  0x1a   :  { %v35_v11 = vcombine.low %v30_v8, %v34_v9  ;;  %p94_p12 = pnand %p93_p11, %p87_p8 }
  0x1c   :  { %v42_v13 = vrot.slane %v35_v11, %v41_v10 }
  0x1e   :  { %v44_v14 = vadd.f32 %v42_v13, %v24_v12 }
  0x20   :  { %45 = vst [vmem:[#allocation5] sm:$0xf] %v44_v14 }
  0x21   :  { %97 = shalt.err (!%p94_p12)
}
  0x22   :  { %s98_s26 = scalar_lea.hbm %s159_s2, 64 }
  0x23   :  { %p99_p13 = scmp.ne.s32.totalorder %s159_s2, %s98_s26  ;;  %p102_p0 = scmp.lt.u32.totalorder %s98_s26, %s159_s2 }
  0x25   :  { %p104_p1 = pnand %p102_p0, %p99_p13 }
  0x27   :  { %107 = shalt.err (!%p104_p1)
}
  0x28   :  { %55 = dma.vmem_to_hbm [thread:$0]  %s53_s0, 64, %s159_s2, [#allocation4]  }
  0x29   :  { %110 = dma.done.wait [#allocation4], 64  }
  0x2a   :  { %111 = vsyncadd [#allocation4], 4294967232 }
  0x2b   :  { %59 = vsyncpa [#allocation3], 1 }
  0x2c   :  { %60 = vsyncpa [#allocation4], 1 }

</bundles_post_ra>
